<compile_context>
chip_gen: v5e
topology: v5e:2x2
jax: 0.10.0
libtpu: 0.0.40
codegen_flags: <defaults>
</compile_context>

<pallas_src>
import functools
import math
from typing import NamedTuple

import jax
import jax.numpy as jnp
from jax.experimental import pallas as pl
from jax.experimental.pallas import tpu as pltpu


class DecoderConfig(NamedTuple):
    L: int   # n_layers
    H: int   # hidden_dim
    E: int   # emb_dim
    V: int   # output_dim (vocab)
    Vp: int  # vocab padded to a multiple of 128 (lane-dense fc store)


# --------------------------------------------------------------------------
# Kernel
# --------------------------------------------------------------------------
def _decoder_kernel(L, H, *refs):
    # inputs
    (emb_ref,        # [B, E]            embedded token
     state_ref,      # [B, 2*L*H]        packed [h_0..h_{L-1} | c_0..c_{L-1}]
     enc_ref,        # [B, S, H]         encoder outputs
     encp_ref,       # [B, S, H]         precomputed enc @ Wa_e + b_a
     wa_h_ref,       # [H, H]            attention W (hidden part), transposed
     v_ref,          # [1, H]            attention scoring vector
     w0_ref,         # [E+2H, 4H]        fused layer-0 weights (emb|weighted|h0)
     b0_ref,         # [1, 4H]           b_ih0 + b_hh0
     ) = refs[:8]
    layer_refs = refs[8:8 + 2 * (L - 1)]            # per upper layer: [2H,4H], [1,4H]
    wfc_ref, bfc_ref, pred_ref, state_out_ref = refs[8 + 2 * (L - 1):]

    embedded = emb_ref[...]                         # [B, E]
    state = state_ref[...]                          # [B, 2*L*H]
    enc = enc_ref[...]                              # [B, S, H]

    # ---- attention: softmax_s( v . tanh(Wa [h_top ; enc_s] + b) ) ----
    h_top = state[:, (L - 1) * H:L * H]                                           # [B, H]
    hid_proj = jnp.dot(h_top, wa_h_ref[...], preferred_element_type=jnp.float32)  # [B, H]
    energy = jnp.tanh(encp_ref[...] + hid_proj[:, None, :])                       # [B, S, H]
    scores = jnp.sum(energy * v_ref[...][None, :, :], axis=-1)                    # [B, S]
    scores = scores - jnp.max(scores, axis=-1, keepdims=True)
    p = jnp.exp(scores)
    a = p * pl.reciprocal(jnp.sum(p, axis=-1, keepdims=True), approx=True)        # [B, S]

    # ---- weighted = bmm(a.unsqueeze(1), encoder_outputs).squeeze(1) ----
    weighted = jnp.sum(a[:, :, None] * enc, axis=1)                               # [B, H]

    # ---- multi-layer LSTM single step (gate order i, f, g, o as in PyTorch) ----
    def lstm_step(gates, c_prev):
        i = jax.nn.sigmoid(gates[:, 0 * H:1 * H])
        f = jax.nn.sigmoid(gates[:, 1 * H:2 * H])
        g = jnp.tanh(gates[:, 2 * H:3 * H])
        o = jax.nn.sigmoid(gates[:, 3 * H:4 * H])
        c_new = f * c_prev + i * g
        h_new = o * jnp.tanh(c_new)
        return h_new, c_new

    h_out, c_out = [], []

    # layer 0: single fused MXU pass over K = E + 2H
    x0 = jnp.concatenate([embedded, weighted, state[:, 0:H]], axis=-1)            # [B, E+2H]
    gates = jnp.dot(x0, w0_ref[...], preferred_element_type=jnp.float32) + b0_ref[...]
    h, c = lstm_step(gates, state[:, L * H:(L + 1) * H])
    h_out.append(h); c_out.append(c)
    x = h

    # upper layers: single fused MXU pass over K = 2H each
    for l in range(1, L):
        wl_ref = layer_refs[2 * (l - 1)]
        bl_ref = layer_refs[2 * (l - 1) + 1]
        # inter-layer dropout is identity in eval mode
        xin = jnp.concatenate([x, state[:, l * H:(l + 1) * H]], axis=-1)          # [B, 2H]
        gates = jnp.dot(xin, wl_ref[...], preferred_element_type=jnp.float32) + bl_ref[...]
        h, c = lstm_step(gates, state[:, (L + l) * H:(L + l + 1) * H])
        h_out.append(h); c_out.append(c)
        x = h

    # ---- fc_out( cat(output, weighted, embedded) ) as one fused matmul ----
    xf = jnp.concatenate([x, weighted, embedded], axis=-1)                        # [B, 2H+E]
    pred_ref[...] = (jnp.dot(xf, wfc_ref[...], preferred_element_type=jnp.float32)
                     + bfc_ref[...])                                              # [B, Vp] lane-dense

    # one lane-dense store of the full packed state
    state_out_ref[...] = jnp.concatenate(h_out + c_out, axis=-1)                  # [B, 2*L*H]


# --------------------------------------------------------------------------
# One-time / per-sequence preprocessing (hoisted out of the decode loop)
# --------------------------------------------------------------------------
def prepare_params(params):
    """Build fused / transposed / padded weights once per model.
    Returns (static config, pytree of device arrays)."""
    H = params["attn_w"].shape[0]
    V, E = params["embedding"].shape
    L = len(params["w_ih"])
    Vp = ((V + 127) // 128) * 128
    attn_w = params["attn_w"]                              # [H, 2H], cols [hidden | encoder]
    cfg = DecoderConfig(L=L, H=H, E=E, V=V, Vp=Vp)
    wts = {
        "embedding": params["embedding"],                  # [V, E]
        "wa_h": jnp.transpose(attn_w[:, :H]),              # [H, H]
        "wa_e": jnp.transpose(attn_w[:, H:]),              # [H, H] (per-sequence precompute)
        "attn_b": params["attn_b"],                        # [H]
        "attn_v": params["attn_v"].reshape(1, H),          # [1, H]
        # fused layer-0 weight: rows = [embedded(E) | weighted(H) | h0(H)]
        "w0": jnp.concatenate([jnp.transpose(params["w_ih"][0]),
                               jnp.transpose(params["w_hh"][0])], axis=0),   # [E+2H, 4H]
        "b0": (params["b_ih"][0] + params["b_hh"][0]).reshape(1, 4 * H),
        # fused upper-layer weights: rows = [x(H) | h_l(H)]
        "layers": [(jnp.concatenate([jnp.transpose(params["w_ih"][l]),
                                     jnp.transpose(params["w_hh"][l])], axis=0),  # [2H, 4H]
                    (params["b_ih"][l] + params["b_hh"][l]).reshape(1, 4 * H))
                   for l in range(1, L)],
        # fc_out weight already in [output | weighted | embedded] row order after T;
        # pad V -> Vp so the prediction store is lane-dense.
        "wfc": jnp.pad(jnp.transpose(params["fc_w"]), ((0, 0), (0, Vp - V))),     # [2H+E, Vp]
        "bfc": jnp.pad(params["fc_b"], (0, Vp - V)).reshape(1, Vp),               # [1, Vp]
    }
    return cfg, wts


def prepare_encoder(wts, encoder_outputs):
    """Per-sequence precompute: enc @ Wa_e + b_a (invariant across decode steps)."""
    return (jnp.einsum("bsh,hk->bsk", encoder_outputs, wts["wa_e"])
            + wts["attn_b"][None, None, :])


def pack_state(hidden, cell):
    """[L,B,H] hidden/cell -> one lane-dense [B, 2*L*H] state slab."""
    L, B, H = hidden.shape
    h = jnp.transpose(hidden, (1, 0, 2)).reshape(B, L * H)
    c = jnp.transpose(cell, (1, 0, 2)).reshape(B, L * H)
    return jnp.concatenate([h, c], axis=-1)


def unpack_state(state, L, H):
    B = state.shape[0]
    h = jnp.transpose(state[:, :L * H].reshape(B, L, H), (1, 0, 2))
    c = jnp.transpose(state[:, L * H:].reshape(B, L, H), (1, 0, 2))
    return h, c


# --------------------------------------------------------------------------
# Per-step call (fast path for decode loops) — jit-cached, state donated so
# the packed [B, 2*L*H] slab is carried in place across steps.
# --------------------------------------------------------------------------
@functools.partial(jax.jit, static_argnums=(0,), donate_argnums=(4,))
def decoder_step(cfg, wts, enc_proj_b, input_ids, state, encoder_outputs):
    L, H, V, Vp = cfg.L, cfg.H, cfg.V, cfg.Vp
    B, S, _ = encoder_outputs.shape

    # embedding gather (data-dependent lookup) + dropout == identity (eval)
    embedded = jnp.take(wts["embedding"], input_ids, axis=0)            # [B, E]

    args = [embedded, state, encoder_outputs, enc_proj_b,
            wts["wa_h"], wts["attn_v"], wts["w0"], wts["b0"]]
    for wl, bl in wts["layers"]:
        args += [wl, bl]
    args += [wts["wfc"], wts["bfc"]]

    vmem = pl.BlockSpec(memory_space=pltpu.MemorySpace.VMEM)
    pred_p, state_new = pl.pallas_call(
        functools.partial(_decoder_kernel, L, H),
        out_shape=(jax.ShapeDtypeStruct((B, Vp), jnp.float32),
                   jax.ShapeDtypeStruct((B, 2 * L * H), jnp.float32)),
        in_specs=[vmem] * len(args),
        out_specs=(vmem, vmem),
        input_output_aliases={1: 1},   # packed state carried in place
    )(*args)
    return pred_p[:, :V], state_new


# --------------------------------------------------------------------------
# Module-faithful convenience API (matches PyTorch Decoder.forward signature)
# --------------------------------------------------------------------------
def decoder_forward(params, input_ids, hidden, cell, encoder_outputs):
    """For a real decode loop, call prepare_params / prepare_encoder /
    pack_state ONCE and iterate decoder_step — that keeps weight prep and the
    encoder projection out of the per-step path."""
    cfg, wts = prepare_params(params)
    enc_proj_b = prepare_encoder(wts, encoder_outputs)
    state = pack_state(hidden, cell)
    pred, state_new = decoder_step(cfg, wts, enc_proj_b, input_ids, state,
                                   encoder_outputs)
    h_new, c_new = unpack_state(state_new, cfg.L, cfg.H)
    return pred, h_new, c_new


# --------------------------------------------------------------------------
# Pure-JAX reference (mirrors the PyTorch forward, eval mode)
# --------------------------------------------------------------------------
def decoder_reference(params, input_ids, hidden, cell, encoder_outputs):
    L, B, H = hidden.shape
    _, S, _ = encoder_outputs.shape
    V, E = params["embedding"].shape
    embedded = jnp.take(params["embedding"], input_ids, axis=0)           # [B, E]
    h_top = hidden[-1]                                                    # [B, H]
    h_rep = jnp.broadcast_to(h_top[:, None, :], (B, S, H))
    cat_he = jnp.concatenate([h_rep, encoder_outputs], axis=-1)           # [B, S, 2H]
    energy = jnp.tanh(cat_he @ params["attn_w"].T + params["attn_b"])
    scores = jnp.einsum("bsh,h->bs", energy, params["attn_v"])
    a = jax.nn.softmax(scores, axis=-1)
    weighted = jnp.einsum("bs,bsh->bh", a, encoder_outputs)               # [B, H]
    x = jnp.concatenate([embedded, weighted], axis=-1)                    # [B, E+H]
    new_h, new_c = [], []
    for l in range(L):
        gates = (x @ params["w_ih"][l].T + params["b_ih"][l]
                 + hidden[l] @ params["w_hh"][l].T + params["b_hh"][l])
        i = jax.nn.sigmoid(gates[:, 0 * H:1 * H])
        f = jax.nn.sigmoid(gates[:, 1 * H:2 * H])
        g = jnp.tanh(gates[:, 2 * H:3 * H])
        o = jax.nn.sigmoid(gates[:, 3 * H:4 * H])
        c = f * cell[l] + i * g
        h = o * jnp.tanh(c)
        new_h.append(h); new_c.append(c)
        x = h
    out = x
    pred = (jnp.concatenate([out, weighted, embedded], axis=-1)
            @ params["fc_w"].T + params["fc_b"])
    return pred, jnp.stack(new_h), jnp.stack(new_c)


def init_params(key, V, E, H, L):
    keys = iter(jax.random.split(key, 8 + 4 * L))

    def u(k, shape, scale):
        return jax.random.uniform(k, shape, jnp.float32, -scale, scale)

    s_h = 1.0 / math.sqrt(H)
    params = {}
    params["embedding"] = jax.random.normal(next(keys), (V, E), jnp.float32)
    s_a = 1.0 / math.sqrt(2 * H)
    params["attn_w"] = u(next(keys), (H, 2 * H), s_a)
    params["attn_b"] = u(next(keys), (H,), s_a)
    params["attn_v"] = u(next(keys), (H,), s_h)
    w_ih, w_hh, b_ih, b_hh = [], [], [], []
    for l in range(L):
        in_dim = (H + E) if l == 0 else H
        w_ih.append(u(next(keys), (4 * H, in_dim), s_h))
        w_hh.append(u(next(keys), (4 * H, H), s_h))
        b_ih.append(u(next(keys), (4 * H,), s_h))
        b_hh.append(u(next(keys), (4 * H,), s_h))
    params["w_ih"], params["w_hh"] = w_ih, w_hh
    params["b_ih"], params["b_hh"] = b_ih, b_hh
    s_f = 1.0 / math.sqrt(2 * H + E)
    params["fc_w"] = u(next(keys), (V, 2 * H + E), s_f)
    params["fc_b"] = u(next(keys), (V,), s_f)
    return params


if __name__ == "__main__":
    # small shapes consistent with the module:
    # output_dim(V)=64, emb_dim(E)=16, hidden_dim(H)=32, n_layers(L)=2,
    # batch(B)=2, src_len(S)=8
    B, S, E, H, L, V = 2, 8, 16, 32, 2, 64
    key = jax.random.PRNGKey(0)
    kp, ki, kh, kc, ke = jax.random.split(key, 5)
    params = init_params(kp, V, E, H, L)
    input_ids = jax.random.randint(ki, (B,), 0, V)
    hidden = jax.random.normal(kh, (L, B, H), jnp.float32)
    cell = jax.random.normal(kc, (L, B, H), jnp.float32)
    encoder_outputs = jax.random.normal(ke, (B, S, H), jnp.float32)

    # ---- module-faithful single step + correctness check ----
    pred, hid_new, cell_new = decoder_forward(params, input_ids, hidden, cell,
                                              encoder_outputs)
    jax.block_until_ready((pred, hid_new, cell_new))

    pred_r, hid_r, cell_r = decoder_reference(params, input_ids, hidden, cell,
                                              encoder_outputs)
    assert jnp.allclose(pred, pred_r, atol=2e-2, rtol=2e-2)
    assert jnp.allclose(hid_new, hid_r, atol=2e-2, rtol=2e-2)
    assert jnp.allclose(cell_new, cell_r, atol=2e-2, rtol=2e-2)

    # ---- amortized decode-loop usage: prepare once, iterate the jitted step ----
    # (weights / encoder projection reused; packed state donated + aliased in place)
    cfg, wts = prepare_params(params)
    enc_proj_b = prepare_encoder(wts, encoder_outputs)
    st = pack_state(hidden, cell)
    ids = input_ids
    for _ in range(4):
        step_pred, st = decoder_step(cfg, wts, enc_proj_b, ids, st,
                                     encoder_outputs)
        ids = jnp.argmax(step_pred, axis=-1)
    jax.block_until_ready((step_pred, st))

    print("KERNEL_OK")
</pallas_src>

<mosaic_0001>
module attributes {stable_mosaic.version = 11 : i64} {
  func.func @_decoder_kernel(%arg0: memref<2x16xf32, #tpu.memory_space<vmem>>, %arg1: memref<2x128xf32, #tpu.memory_space<vmem>>, %arg2: memref<2x8x32xf32, #tpu.memory_space<vmem>>, %arg3: memref<2x8x32xf32, #tpu.memory_space<vmem>>, %arg4: memref<32x32xf32, #tpu.memory_space<vmem>>, %arg5: memref<1x32xf32, #tpu.memory_space<vmem>>, %arg6: memref<80x128xf32, #tpu.memory_space<vmem>>, %arg7: memref<1x128xf32, #tpu.memory_space<vmem>>, %arg8: memref<64x128xf32, #tpu.memory_space<vmem>>, %arg9: memref<1x128xf32, #tpu.memory_space<vmem>>, %arg10: memref<80x128xf32, #tpu.memory_space<vmem>>, %arg11: memref<1x128xf32, #tpu.memory_space<vmem>>, %arg12: memref<2x128xf32, #tpu.memory_space<vmem>>, %arg13: memref<2x128xf32, #tpu.memory_space<vmem>>) attributes {dimension_semantics = [], scalar_prefetch = 0 : i64, scratch_operands = 0 : i64, tpu.core_type = #tpu.core_type<tc>} {
    %c0 = arith.constant 0 : index
    %c0_0 = arith.constant 0 : index
    %0 = vector.load %arg0[%c0, %c0_0] : memref<2x16xf32, #tpu.memory_space<vmem>>, vector<2x16xf32>
    %c0_1 = arith.constant 0 : index
    %c0_2 = arith.constant 0 : index
    %1 = vector.load %arg1[%c0_1, %c0_2] : memref<2x128xf32, #tpu.memory_space<vmem>>, vector<2x128xf32>
    %c0_3 = arith.constant 0 : index
    %c0_4 = arith.constant 0 : index
    %c0_5 = arith.constant 0 : index
    %2 = vector.load %arg2[%c0_3, %c0_4, %c0_5] : memref<2x8x32xf32, #tpu.memory_space<vmem>>, vector<2x8x32xf32>
    %3 = vector.extract_strided_slice %1 {offsets = [0, 32], sizes = [2, 32], strides = [1, 1]} : vector<2x128xf32> to vector<2x32xf32>
    %c0_6 = arith.constant 0 : index
    %c0_7 = arith.constant 0 : index
    %4 = vector.load %arg4[%c0_6, %c0_7] : memref<32x32xf32, #tpu.memory_space<vmem>>, vector<32x32xf32>
    %cst = arith.constant dense<0.000000e+00> : vector<2x32xf32>
    %5 = tpu.matmul %3, %4, %cst {dimension_numbers = #tpu.dot_dimension_numbers<[1], [0], [0], [1], [0, 0, 1, 1], [], []>} : vector<2x32xf32>, vector<32x32xf32>, vector<2x32xf32> -> vector<2x32xf32>
    %c0_8 = arith.constant 0 : index
    %c0_9 = arith.constant 0 : index
    %c0_10 = arith.constant 0 : index
    %6 = vector.load %arg3[%c0_8, %c0_9, %c0_10] : memref<2x8x32xf32, #tpu.memory_space<vmem>>, vector<2x8x32xf32>
    %7 = vector.shape_cast %5 : vector<2x32xf32> to vector<2x1x32xf32>
    %8 = vector.broadcast %7 : vector<2x1x32xf32> to vector<2x8x32xf32>
    %9 = arith.addf %6, %8 : vector<2x8x32xf32>
    %10 = math.tanh %9 : vector<2x8x32xf32>
    %c0_11 = arith.constant 0 : index
    %c0_12 = arith.constant 0 : index
    %11 = vector.load %arg5[%c0_11, %c0_12] : memref<1x32xf32, #tpu.memory_space<vmem>>, vector<1x32xf32>
    %12 = vector.shape_cast %11 : vector<1x32xf32> to vector<1x1x32xf32>
    %13 = vector.broadcast %12 : vector<1x1x32xf32> to vector<2x8x32xf32>
    %14 = arith.mulf %10, %13 : vector<2x8x32xf32>
    %cst_13 = arith.constant dense<0.000000e+00> : vector<2x8xf32>
    %15 = vector.multi_reduction <add>, %14, %cst_13 [2] : vector<2x8x32xf32> to vector<2x8xf32>
    %cst_14 = arith.constant dense<0xFF800000> : vector<2xf32>
    %16 = vector.multi_reduction <maximumf>, %15, %cst_14 [1] : vector<2x8xf32> to vector<2xf32>
    %17 = vector.shape_cast %16 : vector<2xf32> to vector<2x1xf32>
    %18 = vector.broadcast %17 : vector<2x1xf32> to vector<2x8xf32>
    %19 = arith.subf %15, %18 : vector<2x8xf32>
    %20 = math.exp %19 : vector<2x8xf32>
    %cst_15 = arith.constant dense<0.000000e+00> : vector<2xf32>
    %21 = vector.multi_reduction <add>, %20, %cst_15 [1] : vector<2x8xf32> to vector<2xf32>
    %22 = vector.shape_cast %21 : vector<2xf32> to vector<2x1xf32>
    %23 = tpu.reciprocal %22 {approx = true} : vector<2x1xf32> -> vector<2x1xf32>
    %24 = vector.broadcast %23 : vector<2x1xf32> to vector<2x8xf32>
    %25 = arith.mulf %20, %24 : vector<2x8xf32>
    %26 = vector.shape_cast %25 : vector<2x8xf32> to vector<2x8x1xf32>
    %27 = vector.broadcast %26 : vector<2x8x1xf32> to vector<2x8x32xf32>
    %28 = arith.mulf %27, %2 : vector<2x8x32xf32>
    %cst_16 = arith.constant dense<0.000000e+00> : vector<2x32xf32>
    %29 = vector.multi_reduction <add>, %28, %cst_16 [1] : vector<2x8x32xf32> to vector<2x32xf32>
    %30 = vector.extract_strided_slice %1 {offsets = [0, 0], sizes = [2, 32], strides = [1, 1]} : vector<2x128xf32> to vector<2x32xf32>
    %31 = tpu.concatenate %0, %29, %30 in 1 : vector<2x16xf32>, vector<2x32xf32>, vector<2x32xf32> -> vector<2x80xf32>
    %c0_17 = arith.constant 0 : index
    %c0_18 = arith.constant 0 : index
    %32 = vector.load %arg6[%c0_17, %c0_18] : memref<80x128xf32, #tpu.memory_space<vmem>>, vector<80x128xf32>
    %cst_19 = arith.constant dense<0.000000e+00> : vector<2x128xf32>
    %33 = tpu.matmul %31, %32, %cst_19 {dimension_numbers = #tpu.dot_dimension_numbers<[1], [0], [0], [1], [0, 0, 1, 1], [], []>} : vector<2x80xf32>, vector<80x128xf32>, vector<2x128xf32> -> vector<2x128xf32>
    %c0_20 = arith.constant 0 : index
    %c0_21 = arith.constant 0 : index
    %34 = vector.load %arg7[%c0_20, %c0_21] : memref<1x128xf32, #tpu.memory_space<vmem>>, vector<1x128xf32>
    %35 = vector.broadcast %34 : vector<1x128xf32> to vector<2x128xf32>
    %36 = arith.addf %33, %35 : vector<2x128xf32>
    %37 = vector.extract_strided_slice %1 {offsets = [0, 64], sizes = [2, 32], strides = [1, 1]} : vector<2x128xf32> to vector<2x32xf32>
    %38 = vector.extract_strided_slice %36 {offsets = [0, 0], sizes = [2, 32], strides = [1, 1]} : vector<2x128xf32> to vector<2x32xf32>
    %39 = arith.negf %38 : vector<2x32xf32>
    %40 = math.exp %39 : vector<2x32xf32>
    %cst_22 = arith.constant 1.000000e+00 : f32
    %41 = vector.broadcast %cst_22 : f32 to vector<2x32xf32>
    %42 = arith.addf %41, %40 : vector<2x32xf32>
    %43 = arith.divf %41, %42 : vector<2x32xf32>
    %44 = vector.extract_strided_slice %36 {offsets = [0, 32], sizes = [2, 32], strides = [1, 1]} : vector<2x128xf32> to vector<2x32xf32>
    %45 = arith.negf %44 : vector<2x32xf32>
    %46 = math.exp %45 : vector<2x32xf32>
    %cst_23 = arith.constant 1.000000e+00 : f32
    %47 = vector.broadcast %cst_23 : f32 to vector<2x32xf32>
    %48 = arith.addf %47, %46 : vector<2x32xf32>
    %49 = arith.divf %47, %48 : vector<2x32xf32>
    %50 = vector.extract_strided_slice %36 {offsets = [0, 64], sizes = [2, 32], strides = [1, 1]} : vector<2x128xf32> to vector<2x32xf32>
    %51 = math.tanh %50 : vector<2x32xf32>
    %52 = vector.extract_strided_slice %36 {offsets = [0, 96], sizes = [2, 32], strides = [1, 1]} : vector<2x128xf32> to vector<2x32xf32>
    %53 = arith.negf %52 : vector<2x32xf32>
    %54 = math.exp %53 : vector<2x32xf32>
    %cst_24 = arith.constant 1.000000e+00 : f32
    %55 = vector.broadcast %cst_24 : f32 to vector<2x32xf32>
    %56 = arith.addf %55, %54 : vector<2x32xf32>
    %57 = arith.divf %55, %56 : vector<2x32xf32>
    %58 = arith.mulf %49, %37 : vector<2x32xf32>
    %59 = arith.mulf %43, %51 : vector<2x32xf32>
    %60 = arith.addf %58, %59 : vector<2x32xf32>
    %61 = math.tanh %60 : vector<2x32xf32>
    %62 = arith.mulf %57, %61 : vector<2x32xf32>
    %63 = vector.extract_strided_slice %1 {offsets = [0, 32], sizes = [2, 32], strides = [1, 1]} : vector<2x128xf32> to vector<2x32xf32>
    %64 = tpu.concatenate %62, %63 in 1 : vector<2x32xf32>, vector<2x32xf32> -> vector<2x64xf32>
    %c0_25 = arith.constant 0 : index
    %c0_26 = arith.constant 0 : index
    %65 = vector.load %arg8[%c0_25, %c0_26] : memref<64x128xf32, #tpu.memory_space<vmem>>, vector<64x128xf32>
    %cst_27 = arith.constant dense<0.000000e+00> : vector<2x128xf32>
    %66 = tpu.matmul %64, %65, %cst_27 {dimension_numbers = #tpu.dot_dimension_numbers<[1], [0], [0], [1], [0, 0, 1, 1], [], []>} : vector<2x64xf32>, vector<64x128xf32>, vector<2x128xf32> -> vector<2x128xf32>
    %c0_28 = arith.constant 0 : index
    %c0_29 = arith.constant 0 : index
    %67 = vector.load %arg9[%c0_28, %c0_29] : memref<1x128xf32, #tpu.memory_space<vmem>>, vector<1x128xf32>
    %68 = vector.broadcast %67 : vector<1x128xf32> to vector<2x128xf32>
    %69 = arith.addf %66, %68 : vector<2x128xf32>
    %70 = vector.extract_strided_slice %1 {offsets = [0, 96], sizes = [2, 32], strides = [1, 1]} : vector<2x128xf32> to vector<2x32xf32>
    %71 = vector.extract_strided_slice %69 {offsets = [0, 0], sizes = [2, 32], strides = [1, 1]} : vector<2x128xf32> to vector<2x32xf32>
    %72 = arith.negf %71 : vector<2x32xf32>
    %73 = math.exp %72 : vector<2x32xf32>
    %cst_30 = arith.constant 1.000000e+00 : f32
    %74 = vector.broadcast %cst_30 : f32 to vector<2x32xf32>
    %75 = arith.addf %74, %73 : vector<2x32xf32>
    %76 = arith.divf %74, %75 : vector<2x32xf32>
    %77 = vector.extract_strided_slice %69 {offsets = [0, 32], sizes = [2, 32], strides = [1, 1]} : vector<2x128xf32> to vector<2x32xf32>
    %78 = arith.negf %77 : vector<2x32xf32>
    %79 = math.exp %78 : vector<2x32xf32>
    %cst_31 = arith.constant 1.000000e+00 : f32
    %80 = vector.broadcast %cst_31 : f32 to vector<2x32xf32>
    %81 = arith.addf %80, %79 : vector<2x32xf32>
    %82 = arith.divf %80, %81 : vector<2x32xf32>
    %83 = vector.extract_strided_slice %69 {offsets = [0, 64], sizes = [2, 32], strides = [1, 1]} : vector<2x128xf32> to vector<2x32xf32>
    %84 = math.tanh %83 : vector<2x32xf32>
    %85 = vector.extract_strided_slice %69 {offsets = [0, 96], sizes = [2, 32], strides = [1, 1]} : vector<2x128xf32> to vector<2x32xf32>
    %86 = arith.negf %85 : vector<2x32xf32>
    %87 = math.exp %86 : vector<2x32xf32>
    %cst_32 = arith.constant 1.000000e+00 : f32
    %88 = vector.broadcast %cst_32 : f32 to vector<2x32xf32>
    %89 = arith.addf %88, %87 : vector<2x32xf32>
    %90 = arith.divf %88, %89 : vector<2x32xf32>
    %91 = arith.mulf %82, %70 : vector<2x32xf32>
    %92 = arith.mulf %76, %84 : vector<2x32xf32>
    %93 = arith.addf %91, %92 : vector<2x32xf32>
    %94 = math.tanh %93 : vector<2x32xf32>
    %95 = arith.mulf %90, %94 : vector<2x32xf32>
    %96 = tpu.concatenate %95, %29, %0 in 1 : vector<2x32xf32>, vector<2x32xf32>, vector<2x16xf32> -> vector<2x80xf32>
    %c0_33 = arith.constant 0 : index
    %c0_34 = arith.constant 0 : index
    %97 = vector.load %arg10[%c0_33, %c0_34] : memref<80x128xf32, #tpu.memory_space<vmem>>, vector<80x128xf32>
    %cst_35 = arith.constant dense<0.000000e+00> : vector<2x128xf32>
    %98 = tpu.matmul %96, %97, %cst_35 {dimension_numbers = #tpu.dot_dimension_numbers<[1], [0], [0], [1], [0, 0, 1, 1], [], []>} : vector<2x80xf32>, vector<80x128xf32>, vector<2x128xf32> -> vector<2x128xf32>
    %c0_36 = arith.constant 0 : index
    %c0_37 = arith.constant 0 : index
    %99 = vector.load %arg11[%c0_36, %c0_37] : memref<1x128xf32, #tpu.memory_space<vmem>>, vector<1x128xf32>
    %100 = vector.broadcast %99 : vector<1x128xf32> to vector<2x128xf32>
    %101 = arith.addf %98, %100 : vector<2x128xf32>
    %c0_38 = arith.constant 0 : index
    %c0_39 = arith.constant 0 : index
    %102 = vector.load %arg12[%c0_38, %c0_39] : memref<2x128xf32, #tpu.memory_space<vmem>>, vector<2x128xf32>
    tpu.vector_store %arg12[%c0_38, %c0_39], %101 {strides = array<i32>} : memref<2x128xf32, #tpu.memory_space<vmem>>, vector<2x128xf32>,
    %103 = tpu.concatenate %62, %95, %60, %93 in 1 : vector<2x32xf32>, vector<2x32xf32>, vector<2x32xf32>, vector<2x32xf32> -> vector<2x128xf32>
    %c0_40 = arith.constant 0 : index
    %c0_41 = arith.constant 0 : index
    %104 = vector.load %arg13[%c0_40, %c0_41] : memref<2x128xf32, #tpu.memory_space<vmem>>, vector<2x128xf32>
    tpu.vector_store %arg13[%c0_40, %c0_41], %103 {strides = array<i32>} : memref<2x128xf32, #tpu.memory_space<vmem>>, vector<2x128xf32>,
    return
  }
}

</mosaic_0001>

<bundles_post_ra>
// kernel: decoder_step.1
= control target key start
LH: loop header
LB: loop body
LE: loop exit
PB: predicated region body
PF: predicated region fallthrough
CT: control target
= control target key end

     0   :  { %19 = vsyncpa [#allocation3], 0  ;;  %s893_s0 = inlined_call_operand.vmem [shape: f32[2,16], index: 0, kind: input, shape index: {}]   ;;  %s894_s1 = inlined_call_operand.vmem [shape: f32[2,128], index: 1, kind: input, shape index: {}, may-alias: {1,13}]   ;;  %s895_s2 = inlined_call_operand.hbm [shape: f32[2,8,32], index: 2, kind: input, shape index: {}]   ;;  %s896_s3 = inlined_call_operand.hbm [shape: f32[2,8,32], index: 3, kind: input, shape index: {}]   ;;  %s897_s4 = inlined_call_operand.vmem [shape: f32[32,32], index: 4, kind: input, shape index: {}]   ;;  %s898_s5 = inlined_call_operand.vmem [shape: f32[1,32], index: 5, kind: input, shape index: {}]   ;;  %s899_s6 = inlined_call_operand.vmem [shape: f32[80,128], index: 6, kind: input, shape index: {}]   ;;  %s900_s7 = inlined_call_operand.vmem [shape: f32[1,128], index: 7, kind: input, shape index: {}]   ;;  %s901_s8 = inlined_call_operand.hbm [shape: f32[64,128], index: 8, kind: input, shape index: {}]   ;;  %s902_s9 = inlined_call_operand.vmem [shape: f32[1,128], index: 9, kind: input, shape index: {}]   ;;  %s903_s10 = inlined_call_operand.hbm [shape: f32[80,128], index: 10, kind: input, shape index: {}]   ;;  %s904_s11 = inlined_call_operand.vmem [shape: f32[1,128], index: 11, kind: input, shape index: {}]   ;;  %s905_s12 = inlined_call_operand.hbm [shape: f32[2,128], index: 12, kind: output, shape index: {0}]   ;;  %s906_s13 = inlined_call_operand.vmem [shape: f32[2,128], index: 13, kind: output, shape index: {1}, may-alias: {1,13}]  }
   0x1   :  { %20 = vsyncpa [#allocation6], 0 }
   0x2   :  { %21 = vsyncpa [#allocation9], 0 }
   0x3   :  { %22 = vsyncpa [#allocation4], 0  ;;  %s44_s27 = sshll.u32 %s896_s3, 4  ;;  %s678_s28 = smov [#allocation5]   ;;  %s45_s27 = int_to_ptr.hbm [resolvable:$true] %s44_s27 }
   0x4   :  { %s46_s29 = sshll.u32 %s678_s28, 4  ;;  %s31_s15 = sshll.u32 %s895_s2, 4  ;;  %s47_s29 = int_to_ptr.vmem [resolvable:$true] %s46_s29  ;;  %s32_s15 = int_to_ptr.hbm [resolvable:$true] %s31_s15 }
   0x5   :  { %s679_s16 = smov 128   ;;  %s680_s17 = smov 8  }
   0x6   :  { %52 = dma.hbm_to_vmem [thread:$0]  %s45_s27, 256, %s47_s29, [#allocation6], %s679_s16, %s679_s16, %s680_s17  }
   0x7   :  { %s681_s18 = smov [#allocation2]   ;;  %s65_s22 = sshll.u32 %s901_s8, 4  ;;  %s66_s22 = int_to_ptr.hbm [resolvable:$true] %s65_s22 }
   0x8   :  { %s33_s19 = sshll.u32 %s681_s18, 4  ;;  %s80_s24 = sshll.u32 %s903_s10, 4  ;;  %s34_s19 = int_to_ptr.vmem [resolvable:$true] %s33_s19  ;;  %s81_s24 = int_to_ptr.hbm [resolvable:$true] %s80_s24 }
   0x9   :  { %39 = dma.hbm_to_vmem [thread:$0]  %s32_s15, 256, %s34_s19, [#allocation3], %s679_s16, %s679_s16, %s680_s17  }
   0xa   :  { %s682_s25 = smov [#allocation7]   ;;  %s683_s2 = smov [#allocation8]  }
   0xb   :  { %s67_s26 = sshll.u32 %s682_s25, 4  ;;  %s82_s27 = sshll.u32 %s683_s2, 4  ;;  %s68_s26 = int_to_ptr.vmem [resolvable:$true] %s67_s26  ;;  %s83_s27 = int_to_ptr.vmem [resolvable:$true] %s82_s27 }
   0xc   :  { %73 = dma.hbm_to_vmem [thread:$0]  %s66_s22, 1024, %s68_s26, [#allocation6], %s679_s16, %s679_s16, %s680_s17  }
   0xd   :  { %88 = dma.hbm_to_vmem [thread:$0]  %s81_s24, 1280, %s83_s27, [#allocation9], %s679_s16, %s679_s16, %s680_s17  }
   0xe   :  { %670 = dma.done.wait [#allocation3], 256  }
   0xf   :  { %671 = vsyncadd [#allocation3], 4294967040 }
  0x10   :  { %672 = dma.done.wait [#allocation6], 1280  }
  0x11   :  { %673 = vsyncadd [#allocation6], 4294966016 }
  0x12   :  { %674 = dma.done.wait [#allocation9], 1280  }
  0x13   :  { %675 = vsyncadd [#allocation9], 4294966016  ;;  %v776_v0 = vld [vmem:[%s894_s1] sm:$0x3]  ;;  %v114_v1 = vld [vmem:[%s897_s4 + $0x18] sm:$0xff]  ;;  %s684_s15 = smov 96   ;;  %v167_v21 = vlaneseq }
  0x14   :  { %v113_v2 = vld [vmem:[%s897_s4 + $0x10] sm:$0xff]  ;;  %116 = vrot.lane.b32.xlu0 %v776_v0, %s684_s15  ;;  %133 = vmatpush.msra.mxu0 %v114_v1  ;;  %v112_v3 = vld [vmem:[%s897_s4 + $0x8] sm:$0xff]  ;;  %v111_v4 = vld [vmem:[%s897_s4] sm:$0xff]  ;;  %vm118_vm0 = vcmask 261120   ;;  %vm171_vm1 = vcmask 1041409   ;;  %vm174_vm2 = vcmask 58368  }
  0x15   :  { %v141_v7 = vld [vmem:[#allocation5] sm:$0xff]  ;;  %v142_v10 = vld [vmem:[#allocation5 + $0x8] sm:$0xff]  ;;  %v520_v14 = vld [vmem:[%s898_s5] ss:$0 sm:$0xff]  ;;  %v168_v22 = vand.u32 127, %v167_v21  ;;  %v685_v29 = vmov 0  }
  0x16   :  { %134 = vmatpush.msra.mxu0 %v113_v2  ;;  %517 = vset.pattern.permute.xlu2 %v685_v29  ;;  %v109_v51 = vld [vmem:[#allocation2] sm:$0xff]  ;;  %v260_v55 = vld [vmem:[%s899_s6 + $0x48] sm:$0xff]  ;;  %v258_v58 = vld [vmem:[%s899_s6 + $0x38] sm:$0xff]  ;;  %s686_s27 = smov 16   ;;  %s687_s8 = smov 48   ;;  %vm247_vm3 = vcmask 130048  }
  0x17   :  { %518 = vset.pattern.permute.xlu1 %v685_v29  ;;  %519 = vset.pattern.permute.xlu0 %v685_v29  ;;  %v259_v56 = vld [vmem:[%s899_s6 + $0x40] sm:$0xff]  ;;  %v257_v59 = vld [vmem:[%s899_s6 + $0x30] sm:$0xff]  ;;  %v110_v61 = vld [vmem:[#allocation2 + $0x8] sm:$0xff]  ;;  %vm249_vm4 = vcmask 392192   ;;  %vm265_vm5 = vcmask 654336   ;;  %vm344_vm10 = vcmask 523264  }
  0x18   :  { %135 = vmatpush.msra.mxu0 %v112_v3  ;;  %275 = vmatpush.msra.mxu1 %v260_v55  ;;  %v256_v62 = vld [vmem:[%s899_s6 + $0x28] sm:$0xff]  ;;  %v844_v21 = vld [vmem:[%s893_s0] sm:$0x3]  ;;  %s689_s0 = smov 32   ;;  %vm472_vm15 = vcmask 785408   ;;  %s690_s24 = smov [#allocation10]  }
  0x19   :  { %s480_s25 = sshll.u32 %s690_s24, 4  ;;  %s481_s25 = int_to_ptr.vmem [resolvable:$true] %s480_s25 }
  0x1a   :  { %136 = vmatpush.msra.mxu0 %v111_v4  ;;  %276 = vmatpush.msra.mxu1 %v259_v56  ;;  %v332_v56 = vld [vmem:[#allocation7] sm:$0xff] }
  0x1c   :  { %277 = vmatpush.msra.mxu1 %v258_v58 }
  0x1e   :  { %278 = vmatpush.msra.mxu1 %v257_v59  ;;  %v522_v59 = vld [vmem:[%s902_s9] ss:$0 sm:$0xff] }
  0x20   :  { %279 = vmatpush.msra.mxu1 %v256_v62 }
  0x86   :  { %v791_v5 = vpop.permute.xlu0 %116 }
  0x87   :  { %498 = vmatmul.msk.f32.vlgmr.msra.gmra.mxu0 %vm118_vm0, %v791_v5 }
 0x104   :  { %v138_v6 = vpop.f32.mrf.mxu0 }
 0x105   :  { %v144_v8 = vrot.slane %v138_v6, 1  ;;  %v145_v9 = vperm.slane %v138_v6, 0 }
 0x107   :  { %v146_v11 = vperm.slane %v144_v8, 0  ;;  %v149_v12 = vadd.f32 %v145_v9, %v141_v7 }
 0x109   :  { %v150_v13 = vadd.f32 %v146_v11, %v142_v10  ;;  %524 = vtanh.f32 %v149_v12 }
 0x10b   :  { %526 = vtanh.f32 %v150_v13 }
 0x10f   :  { %v525_v15 = vpop.eup %524 }
 0x110   :  { %v157_v16 = vmul.f32 %v525_v15, %v520_v14  ;;  %v255_v15 = vld [vmem:[%s899_s6 + $0x20] sm:$0xff] }
 0x111   :  { %v527_v17 = vpop.eup %526  ;;  %280 = vmatpush.msra.mxu1 %v255_v15 }
 0x112   :  { %v159_v18 = vsel %vm118_vm0, %v157_v16, 0.0  ;;  %v158_v19 = vmul.f32 %v527_v17, %v520_v14  ;;  %v254_v16 = vld [vmem:[%s899_s6 + $0x18] sm:$0xff]  ;;  %v253_v17 = vld [vmem:[%s899_s6 + $0x10] sm:$0xff] }
 0x113   :  { %160 = vadd.xlane.f32.xlu0 %v159_v18  ;;  %281 = vmatpush.msra.mxu1 %v254_v16  ;;  %v252_v18 = vld [vmem:[%s899_s6 + $0x8] sm:$0xff] }
 0x114   :  { %v162_v20 = vsel %vm118_vm0, %v158_v19, 0.0  ;;  %v251_v19 = vld [vmem:[%s899_s6] sm:$0xff]  ;;  %s688_s6 = smov 64  }
 0x115   :  { %163 = vadd.xlane.f32.xlu1 %v162_v20  ;;  %282 = vmatpush.msra.mxu1 %v253_v17 }
 0x117   :  { %283 = vmatpush.msra.mxu1 %v252_v18 }
 0x119   :  { %284 = vmatpush.msra.mxu1 %v251_v19 }
 0x186   :  { %v161_v23 = vpop.xlane.xlu0 %160 }
 0x187   :  { %v169_v25 = vperm.slane %v161_v23, %v168_v22 }
 0x188   :  { %v164_v24 = vpop.xlane.xlu1 %163 }
 0x189   :  { %v170_v26 = vperm.slane %v164_v24, %v168_v22 }
 0x18b   :  { %v172_v27 = vsel %vm171_vm1, %v170_v26, %v169_v25  ;;  %v521_v25 = vld [vmem:[%s900_s7] ss:$0 sm:$0xff] }
 0x18c   :  { %v175_v28 = vsel %vm174_vm2, %v172_v27, -inf }
 0x18d   :  { %176 = vmax.xlane.f32.xlu1 %v175_v28 }
 0x200   :  { %v177_v30 = vpop.xlane.xlu1 %176 }
 0x201   :  { %v179_v31 = vperm.slane %v177_v30, 0  ;;  %v180_v32 = vperm.slane %v177_v30, 1 }
 0x203   :  { %v183_v33 = vsub.f32 %v161_v23, %v179_v31  ;;  %v184_v35 = vsub.f32 %v164_v24, %v180_v32 }
 0x205   :  { %v185_v34 = vmul.f32 1.442695, %v183_v33  ;;  %v187_v36 = vmul.f32 1.442695, %v184_v35 }
 0x207   :  { %528 = vpow2.f32 %v185_v34 }
 0x208   :  { %530 = vpow2.f32 %v187_v36 }
 0x20d   :  { %v529_v37 = vpop.eup %528 }
 0x20e   :  { %192 = vperm.xlu2 %517, %v529_v37   ;;  %v531_v38 = vpop.eup %530 }
 0x216   :  { %195 = vperm.xlu2 %517, %v531_v38  }
 0x268   :  { %v193_v39 = vpop.permute.xlu2 %192 }
 0x269   :  { %v197_v41 = vperm.slane %v193_v39, %v168_v22 }
 0x270   :  { %v196_v40 = vpop.permute.xlu2 %195 }
 0x271   :  { %v198_v42 = vperm.slane %v196_v40, %v168_v22 }
 0x273   :  { %v199_v43 = vsel %vm171_vm1, %v198_v42, %v197_v41 }
 0x274   :  { %v201_v44 = vsel %vm174_vm2, %v199_v43, 0.0 }
 0x275   :  { %202 = vadd.xlane.f32.xlu1 %v201_v44 }
 0x2e8   :  { %v203_v45 = vpop.xlane.xlu1 %202 }
 0x2e9   :  { %532 = vrcp.f32 %v203_v45 }
 0x2ef   :  { %v533_v46 = vpop.eup %532 }
 0x2f0   :  { %v207_v47 = vperm.slane %v533_v46, 1  ;;  %v206_v48 = vperm.slane %v533_v46, 0 }
 0x2f2   :  { %v211_v49 = vmul.f32 %v531_v38, %v207_v47  ;;  %v210_v50 = vmul.f32 %v529_v37, %v206_v48  ;;  %v339_v48 = vld [vmem:[#allocation7 + $0x38] sm:$0xff] }
 0x2f3   :  { %356 = vmatpush.msra.mxu2 %v339_v48 }
 0x2f4   :  { %219 = vperm.xlu1 %518, %v211_v49   ;;  %214 = vperm.xlu2 %517, %v210_v50   ;;  %v338_v49 = vld [vmem:[#allocation7 + $0x30] sm:$0xff]  ;;  %v337_v50 = vld [vmem:[#allocation7 + $0x28] sm:$0xff] }
 0x2f5   :  { %357 = vmatpush.msra.mxu2 %v338_v49 }
 0x2f7   :  { %358 = vmatpush.msra.mxu2 %v337_v50 }
 0x34e   :  { %v215_v52 = vpop.permute.xlu2 %214 }
 0x34f   :  { %v222_v53 = vmul.f32 %v215_v52, %v109_v51  ;;  %v336_v51 = vld [vmem:[#allocation7 + $0x20] sm:$0xff]  ;;  %v335_v52 = vld [vmem:[#allocation7 + $0x18] sm:$0xff] }
 0x350   :  { %359 = vmatpush.msra.mxu2 %v336_v51 }
 0x351   :  { %v224_v54 = vsel %vm118_vm0, %v222_v53, 0.0  ;;  %v334_v53 = vld [vmem:[#allocation7 + $0x10] sm:$0xff] }
 0x352   :  { %v225_v57 = vrot.slane %v224_v54, 4  ;;  %360 = vmatpush.msra.mxu2 %v335_v52 }
 0x354   :  { %v226_v60 = vadd.f32 %v225_v57, %v224_v54  ;;  %361 = vmatpush.msra.mxu2 %v334_v53 }
 0x356   :  { %v227_v2 = vrot.slane %v226_v60, 2 }
 0x358   :  { %v228_v6 = vadd.f32 %v227_v2, %v226_v60 }
 0x35a   :  { %v229_v9 = vrot.slane %v228_v6, 1 }
 0x35c   :  { %v230_v12 = vadd.f32 %v229_v9, %v228_v6 }
 0x366   :  { %v220_v63 = vpop.permute.xlu1 %219 }
 0x367   :  { %v223_v1 = vmul.f32 %v220_v63, %v110_v61 }
 0x369   :  { %v231_v3 = vsel %vm118_vm0, %v223_v1, 0.0 }
 0x36a   :  { %v232_v4 = vrot.slane %v231_v3, 4 }
 0x36c   :  { %v233_v7 = vadd.f32 %v232_v4, %v231_v3 }
 0x36e   :  { %v234_v8 = vrot.slane %v233_v7, 2 }
 0x370   :  { %v235_v10 = vadd.f32 %v234_v8, %v233_v7 }
 0x372   :  { %v236_v11 = vrot.slane %v235_v10, 1 }
 0x374   :  { %v237_v13 = vadd.f32 %v236_v11, %v235_v10 }
 0x376   :  { %v822_v14 = vsel %vm171_vm1, %v237_v13, %v230_v12 }
 0x377   :  { %241 = vrot.lane.b32.xlu2 %v822_v14, %s686_s27  ;;  %s482_s27 = sshll.u32 %s905_s12, 4  ;;  %s483_s27 = int_to_ptr.hbm [resolvable:$true] %s482_s27 }
 0x37f   :  { %244 = vrot.lane.b32.xlu2 %v776_v0, %s687_s8 }
 0x3d1   :  { %v242_v20 = vpop.permute.xlu2 %241 }
 0x3d2   :  { %v248_v22 = vsel %vm247_vm3, %v844_v21, %v242_v20 }
 0x3d9   :  { %v245_v23 = vpop.permute.xlu2 %244 }
 0x3da   :  { %v250_v24 = vsel %vm249_vm4, %v248_v22, %v245_v23  ;;  %v430_v22 = vld [vmem:[#allocation8 + $0x48] sm:$0xff]  ;;  %v429_v23 = vld [vmem:[#allocation8 + $0x40] sm:$0xff] }
 0x3db   :  { %499 = vmatmul.msk.f32.vlgmr.msra.gmra.mxu1 %vm265_vm5, %v250_v24  ;;  %444 = vmatpush.msra.mxu3 %v430_v22  ;;  %v428_v24 = vld [vmem:[#allocation8 + $0x38] sm:$0xff] }
 0x3dd   :  { %445 = vmatpush.msra.mxu3 %v429_v23 }
 0x3df   :  { %446 = vmatpush.msra.mxu3 %v428_v24 }
 0x458   :  { %v286_v26 = vpop.f32.mrf.mxu1 }
 0x459   :  { %v287_v27 = vadd.f32 %v521_v25, %v286_v26  ;;  %v426_v25 = vld [vmem:[#allocation8 + $0x28] sm:$0xff]  ;;  %v425_v26 = vld [vmem:[#allocation8 + $0x20] sm:$0xff] }
 0x45b   :  { %534 = vtanh.f32 %v287_v27  ;;  %v500_v29 = vmul.f32 -1.442695, %v287_v27  ;;  %v424_v27 = vld [vmem:[#allocation8 + $0x18] sm:$0xff] }
 0x45d   :  { %536 = vpow2.f32 %v500_v29  ;;  %v422_v29 = vld [vmem:[#allocation8 + $0x8] sm:$0xff] }
 0x461   :  { %v535_v28 = vpop.eup %534 }
 0x462   :  { %312 = vrot.lane.b32.xlu2 %v535_v28, %s688_s6  ;;  %v423_v28 = vld [vmem:[#allocation8 + $0x10] sm:$0xff] }
 0x463   :  { %v537_v30 = vpop.eup %536 }
 0x464   :  { %v292_v31 = vadd.f32 1.0, %v537_v30 }
 0x466   :  { %538 = vrcp.f32 %v292_v31  ;;  %v304_v37 = vand.u32 2147483648, %v292_v31  ;;  %vm298_vm7 = vweird.f32 %v292_v31  ;;  %v302_v38 = vand.u32 2147483647, %v292_v31 }
 0x468   :  { %v305_v40 = vor.u32 1.1754944e-38, %v304_v37  ;;  %vm303_vm9 = vcmp.eq.f32.partialorder %v302_v38, 8.507059e+37 }
 0x46c   :  { %v539_v32 = vpop.eup %538 }
 0x46d   :  { %v294_v33 = vmul.f32 %v539_v32, %v292_v31  ;;  %vm299_vm6 = vweird.f32 %v539_v32  ;;  %v421_v31 = vld [vmem:[#allocation8] sm:$0xff] }
 0x46e   :  { %vm300_vm8 = vmor %vm298_vm7, %vm299_vm6 }
 0x46f   :  { %v295_v34 = vsub.f32 1.0, %v294_v33 }
 0x471   :  { %v296_v35 = vmul.f32 %v539_v32, %v295_v34 }
 0x473   :  { %v297_v36 = vadd.f32 %v539_v32, %v296_v35 }
 0x475   :  { %v301_v39 = vsel %vm300_vm8, %v539_v32, %v297_v36 }
 0x476   :  { %v306_v42 = vsel %vm303_vm9, %v305_v40, %v301_v39 }
 0x477   :  { %v310_v44 = vmul.f32 %v306_v42, %v791_v5  ;;  %v333_v5 = vld [vmem:[#allocation7 + $0x8] sm:$0xff] }
 0x478   :  { %362 = vmatpush.msra.mxu2 %v333_v5 }
 0x47a   :  { %363 = vmatpush.msra.mxu2 %v332_v56 }
 0x4bc   :  { %v313_v41 = vpop.permute.xlu2 %312 }
 0x4bd   :  { %v315_v43 = vmul.f32 %v313_v41, %v306_v42 }
 0x4bf   :  { %317 = vrot.lane.b32.xlu2 %v315_v43, %s689_s0  ;;  %v523_v43 = vld [vmem:[%s904_s11] ss:$0 sm:$0xff] }
 0x519   :  { %v318_v45 = vpop.permute.xlu2 %317 }
 0x51a   :  { %v320_v46 = vadd.f32 %v318_v45, %v310_v44 }
 0x51c   :  { %540 = vtanh.f32 %v320_v46 }
 0x522   :  { %v541_v47 = vpop.eup %540 }
 0x523   :  { %323 = vrot.lane.b32.xlu1 %v541_v47, %s688_s6 }
 0x52b   :  { %388 = vrot.lane.b32.xlu1 %v776_v0, %s688_s6 }
 0x595   :  { %v324_v54 = vpop.permute.xlu1 %323 }
 0x596   :  { %v326_v55 = vmul.f32 %v324_v54, %v306_v42 }
 0x598   :  { %328 = vrot.lane.b32.xlu0 %v326_v55, %s689_s0 }
 0x59d   :  { %v389_v16 = vpop.permute.xlu1 %388 }
 0x60a   :  { %v858_v57 = vpop.permute.xlu0 %328 }
 0x60b   :  { %v331_v58 = vsel %vm118_vm0, %v858_v57, %v776_v0 }
 0x60c   :  { %501 = vmatmul.msk.f32.vlgmr.msra.gmra.mxu2 %vm344_vm10, %v331_v58 }
 0x68f   :  { %v365_v60 = vpop.f32.mrf.mxu2 }
 0x690   :  { %v366_v61 = vadd.f32 %v522_v59, %v365_v60 }
 0x692   :  { %542 = vtanh.f32 %v366_v61  ;;  %v502_v63 = vmul.f32 -1.442695, %v366_v61 }
 0x694   :  { %544 = vpow2.f32 %v502_v63 }
 0x698   :  { %v543_v62 = vpop.eup %542 }
 0x699   :  { %393 = vrot.lane.b32.xlu2 %v543_v62, %s688_s6 }
 0x69a   :  { %v545_v1 = vpop.eup %544 }
 0x69b   :  { %v371_v2 = vadd.f32 1.0, %v545_v1 }
 0x69d   :  { %546 = vrcp.f32 %v371_v2  ;;  %v383_v8 = vand.u32 2147483648, %v371_v2  ;;  %vm377_vm12 = vweird.f32 %v371_v2  ;;  %v381_v9 = vand.u32 2147483647, %v371_v2 }
 0x69f   :  { %v384_v11 = vor.u32 1.1754944e-38, %v383_v8  ;;  %vm382_vm14 = vcmp.eq.f32.partialorder %v381_v9, 8.507059e+37 }
 0x6a3   :  { %v547_v3 = vpop.eup %546 }
 0x6a4   :  { %v373_v4 = vmul.f32 %v547_v3, %v371_v2  ;;  %vm378_vm11 = vweird.f32 %v547_v3 }
 0x6a5   :  { %vm379_vm13 = vmor %vm377_vm12, %vm378_vm11 }
 0x6a6   :  { %v374_v0 = vsub.f32 1.0, %v373_v4 }
 0x6a8   :  { %v375_v6 = vmul.f32 %v547_v3, %v374_v0 }
 0x6aa   :  { %v376_v7 = vadd.f32 %v547_v3, %v375_v6 }
 0x6ac   :  { %v380_v10 = vsel %vm379_vm13, %v547_v3, %v376_v7 }
 0x6ad   :  { %v385_v12 = vsel %vm382_vm14, %v384_v11, %v380_v10 }
 0x6ae   :  { %v391_v17 = vmul.f32 %v389_v16, %v385_v12 }
 0x6f3   :  { %v394_v13 = vpop.permute.xlu2 %393 }
 0x6f4   :  { %v396_v15 = vmul.f32 %v394_v13, %v385_v12 }
 0x6f6   :  { %398 = vrot.lane.b32.xlu2 %v396_v15, %s689_s0 }
 0x6fe   :  { %412 = vrot.lane.b32.xlu2 %v822_v14, %s689_s0  ;;  %v427_v14 = vld [vmem:[#allocation8 + $0x30] sm:$0xff] }
 0x6ff   :  { %447 = vmatpush.msra.mxu3 %v427_v14 }
 0x701   :  { %448 = vmatpush.msra.mxu3 %v426_v25 }
 0x703   :  { %449 = vmatpush.msra.mxu3 %v425_v26 }
 0x705   :  { %450 = vmatpush.msra.mxu3 %v424_v27 }
 0x706   :  { %463 = vrot.lane.b32.xlu2 %v320_v46, %s689_s0 }
 0x707   :  { %451 = vmatpush.msra.mxu3 %v423_v28 }
 0x709   :  { %452 = vmatpush.msra.mxu3 %v422_v29 }
 0x70b   :  { %453 = vmatpush.msra.mxu3 %v421_v31 }
 0x750   :  { %v399_v18 = vpop.permute.xlu2 %398 }
 0x751   :  { %v401_v19 = vadd.f32 %v399_v18, %v391_v17 }
 0x753   :  { %548 = vtanh.f32 %v401_v19 }
 0x758   :  { %v413_v32 = vpop.permute.xlu2 %412 }
 0x759   :  { %v549_v20 = vpop.eup %548 }
 0x75a   :  { %404 = vrot.lane.b32.xlu1 %v549_v20, %s688_s6 }
 0x760   :  { %v464_v38 = vpop.permute.xlu2 %463 }
 0x762   :  { %416 = vrot.lane.b32.xlu1 %v844_v21, %s688_s6 }
 0x76a   :  { %467 = vrot.lane.b32.xlu1 %v401_v19, %s688_s6 }
 0x7cc   :  { %v405_v21 = vpop.permute.xlu1 %404 }
 0x7cd   :  { %v407_v30 = vmul.f32 %v405_v21, %v385_v12 }
 0x7cf   :  { %409 = vrot.lane.b32.xlu0 %v407_v30, %s689_s0 }
 0x7d4   :  { %v417_v33 = vpop.permute.xlu1 %416 }
 0x7d7   :  { %459 = vrot.lane.b32.xlu0 %v407_v30, %s688_s6 }
 0x7dc   :  { %v468_v40 = vpop.permute.xlu1 %467 }
 0x841   :  { %v410_v34 = vpop.permute.xlu0 %409 }
 0x842   :  { %v419_v35 = vsel %vm118_vm0, %v410_v34, %v413_v32 }
 0x843   :  { %v420_v36 = vsel %vm344_vm10, %v419_v35, %v417_v33 }
 0x844   :  { %503 = vmatmul.msk.f32.vlgmr.msra.gmra.mxu3 %vm265_vm5, %v420_v36 }
 0x849   :  { %v460_v37 = vpop.permute.xlu0 %459 }
 0x84a   :  { %v470_v39 = vsel %vm118_vm0, %v858_v57, %v460_v37 }
 0x84b   :  { %v471_v41 = vsel %vm344_vm10, %v470_v39, %v464_v38 }
 0x84c   :  { %v473_v42 = vsel %vm472_vm15, %v471_v41, %v468_v40 }
 0x84d   :  { %474 = vst [vmem:[%s906_s13] sm:$0x3] %v473_v42 }
 0x8c7   :  { %v455_v44 = vpop.f32.mrf.mxu3 }
 0x8c8   :  { %v456_v45 = vadd.f32 %v523_v43, %v455_v44 }
 0x8ca   :  { %458 = vst [vmem:[#allocation10] sm:$0x3] %v456_v45 }
 0x8cb   :  { %485 = dma.vmem_to_hbm [thread:$0]  %s481_s25, 32, %s483_s27, [#allocation4]  }
 0x8cc   :  { %676 = dma.done.wait [#allocation4], 32  }
 0x8cd   :  { %677 = vsyncadd [#allocation4], 4294967264 }
 0x8ce   :  { %494 = vsyncpa [#allocation3], 1 }
 0x8cf   :  { %495 = vsyncpa [#allocation6], 1 }
 0x8d0   :  { %496 = vsyncpa [#allocation9], 1 }
 0x8d1   :  { %497 = vsyncpa [#allocation4], 1 }

</bundles_post_ra>
